<compile_context>
chip_gen: v5e
topology: v5e:2x2
jax: 0.10.0
libtpu: 0.0.40
codegen_flags: <defaults>
</compile_context>

<pallas_src>
import jax
import jax.numpy as jnp
from jax.experimental import pallas as pl
from jax.experimental.pallas import tpu as pltpu


def unit2mel_embed_kernel(units_ref, fv_ref, spkb_ref, wu_ref, wfv_ref, out_ref):
    # units_ref: (tT, n_unit) bf16    fv_ref:  (tT, 2) f32  [f0, volume]
    # spkb_ref:  (1, H) f32 (spk emb + all three Linear biases, per batch)
    # wu_ref:    (n_unit, H) bf16     wfv_ref: (8, H) f32   [wf; wv; 0...]
    # out_ref:   (tT, H) out_dtype
    x = jnp.dot(units_ref[...], wu_ref[...],
                preferred_element_type=jnp.float32)                # (tT, H) MXU

    # Build [log1p(f0/700), volume] as one lane-dense (tT, 2) operand
    # (log1p is applied to both lanes — harmless, EUP is idle — and lane 1 is
    # selected back to the raw volume), then a tiny K=2 MXU dot.
    fv = fv_ref[...]                                               # (tT, 2)
    col = jax.lax.broadcasted_iota(jnp.int32, fv.shape, 1)
    lfv = jnp.where(col == 0, jnp.log1p(fv * (1.0 / 700.0)), fv)   # (tT, 2)
    x = x + jnp.dot(lfv, wfv_ref[0:2, :],
                    preferred_element_type=jnp.float32)            # (tT, H)

    out_ref[...] = (x + spkb_ref[...]).astype(out_ref.dtype)


def _round_up(x, m):
    return -(-x // m) * m


def _pick_tile_t(T, B, cap=1024):
    """Largest multiple-of-8 T-tile <= cap.

    The kernel is HBM-bound; bigger tiles amortize per-step overhead and the
    VMEM footprint even at tile_t=1024 is ~1-2 MiB (well below every
    generation's VMEM, including v7x's 64 MiB).  When B == 1, cap the tile so
    the T axis still yields >= ~4 grid steps (both v7x TensorCores get work).
    """
    tile = min(cap, _round_up(T, 8))
    if B == 1 and T > 4 * 128:
        tile = min(tile, max(128, _round_up(-(-T // 4), 8)))
    return max(tile, 8)


def unit2mel_embed(units, f0, volume, spk_vec, params, *, tile_t=None,
                   out_dtype=jnp.bfloat16):
    """Fused Unit2Mel conditioning.

    units: (B, T, n_unit); f0, volume: (B, T, 1); spk_vec: (B, 1, H).
    Returns unit_embed(units) + f0_embed(log(1+f0/700)) + volume_embed(volume)
    + spk_vec, shaped (B, T, H).  out_dtype defaults to bf16 because output
    writeback is ~94% of this kernel's HBM bytes.
    """
    B, T, n_unit = units.shape
    H = params["wu"].shape[1]

    # Enforce the MXU-native dtype contract inside the wrapper.
    units = units.astype(jnp.bfloat16)
    wu = params["wu"].astype(jnp.bfloat16)

    if tile_t is None:
        tile_t = _pick_tile_t(T, B)
    assert tile_t % 8 == 0, "tile_t must be a multiple of 8"
    grid_t = -(-T // tile_t)                 # cdiv: no tiny-tile divisor trap
    T_pad = grid_t * tile_t

    # Lane-dense packing of the two per-frame scalars.
    fv = jnp.concatenate([f0, volume], axis=-1).astype(jnp.float32)   # (B,T,2)

    # Zero-pad T to a full tile (padded rows are sliced off below; log1p(0)=0).
    if T_pad != T:
        pad = ((0, 0), (0, T_pad - T), (0, 0))
        units = jnp.pad(units, pad)
        fv = jnp.pad(fv, pad)

    # Fold all three Linear biases into the per-batch speaker vector (O(B*H)).
    spk_bias = (spk_vec.astype(jnp.float32)
                + params["bu"] + params["bf"] + params["bv"])          # (B,1,H)

    # Pack wf / wv into one sublane-aligned (8, H) param buffer.
    wfv = jnp.zeros((8, H), jnp.float32)
    wfv = wfv.at[0].set(params["wf"][0]).at[1].set(params["wv"][0])

    out_bytes = jnp.dtype(out_dtype).itemsize
    cost = pl.CostEstimate(
        flops=2 * B * T_pad * H * (n_unit + 2),
        transcendentals=2 * B * T_pad,
        bytes_accessed=(B * T_pad * n_unit * 2        # units (bf16)
                        + B * T_pad * 2 * 4           # [f0, volume] (f32)
                        + B * H * 4                   # spk + biases
                        + n_unit * H * 2 + 8 * H * 4  # Wu, wfv
                        + B * T_pad * H * out_bytes)) # output writeback

    grid_spec = pltpu.PrefetchScalarGridSpec(
        num_scalar_prefetch=0,
        # b outer (slower) axis: Wu/wfv fetched once, spk_bias only B times.
        grid=(B, grid_t),
        in_specs=[
            pl.BlockSpec((pl.Squeezed(), tile_t, n_unit), lambda b, t: (b, t, 0)),
            pl.BlockSpec((pl.Squeezed(), tile_t, 2),      lambda b, t: (b, t, 0)),
            pl.BlockSpec((pl.Squeezed(), 1, H),           lambda b, t: (b, 0, 0)),
            pl.BlockSpec((n_unit, H),                     lambda b, t: (0, 0)),
            pl.BlockSpec((8, H),                          lambda b, t: (0, 0)),
        ],
        out_specs=pl.BlockSpec((pl.Squeezed(), tile_t, H), lambda b, t: (b, t, 0)),
    )

    out = pl.pallas_call(
        unit2mel_embed_kernel,
        out_shape=jax.ShapeDtypeStruct((B, T_pad, H), out_dtype),
        grid_spec=grid_spec,
        cost_estimate=cost,
        compiler_params=pltpu.CompilerParams(
            dimension_semantics=("parallel", "parallel")),
    )(units, fv, spk_bias, wu, wfv)

    return out[:, :T, :] if T_pad != T else out


def init_params(key, input_channel, n_spk, n_hidden):
    """Deterministic synthetic parameters matching nn.Linear / nn.Embedding shapes."""
    ks = jax.random.split(key, 7)

    def linear(kw, kb, fan_in, fan_out):
        bound = 1.0 / jnp.sqrt(fan_in)
        w = jax.random.uniform(kw, (fan_in, fan_out), jnp.float32, -bound, bound)
        b = jax.random.uniform(kb, (1, fan_out), jnp.float32, -bound, bound)
        return w, b

    wu, bu = linear(ks[0], ks[1], input_channel, n_hidden)  # unit_embed
    wf, bf = linear(ks[2], ks[3], 1, n_hidden)              # f0_embed
    wv, bv = linear(ks[4], ks[5], 1, n_hidden)              # volume_embed
    spk_table = jax.random.normal(ks[6], (n_spk, n_hidden), jnp.float32)
    return {"wu": wu, "bu": bu, "wf": wf, "bf": bf, "wv": wv, "bv": bv,
            "spk_table": spk_table}


def reference_forward(units, f0, volume, spk_vec, params):
    # Matches the kernel's dtype contract: bf16 MXU operands, f32 accumulate.
    u = units.astype(jnp.bfloat16).astype(jnp.float32)
    w = params["wu"].astype(jnp.bfloat16).astype(jnp.float32)
    xu = jnp.einsum("btu,uh->bth", u, w) + params["bu"][None]
    xf = jnp.log1p(f0 / 700.0) * params["wf"][None] + params["bf"][None]
    xv = volume * params["wv"][None] + params["bv"][None]
    return xu + xf + xv + spk_vec


if __name__ == "__main__":
    # Small shapes consistent with the module's forward signature.
    B, T = 2, 200               # T deliberately not a tile multiple (padded-tail path)
    input_channel = 32          # n_unit
    n_hidden = 256              # module default n_hidden
    n_spk = 4

    key = jax.random.PRNGKey(0)
    k_units, k_f0, k_vol, k_spk, k_params = jax.random.split(key, 5)

    units = jax.random.normal(k_units, (B, T, input_channel), jnp.float32)
    f0 = jax.random.uniform(k_f0, (B, T, 1), jnp.float32, 100.0, 400.0)
    volume = jax.random.uniform(k_vol, (B, T, 1), jnp.float32, 0.0, 1.0)
    spk_id = jax.random.randint(k_spk, (B, 1), 1, n_spk + 1)   # 1-based speaker ids

    params = init_params(k_params, input_channel, n_spk, n_hidden)

    # Embedding lookup spk_embed(spk_id - 1): gather done as plain-JAX glue.
    spk_vec = jnp.take(params["spk_table"], spk_id - 1, axis=0)   # (B, 1, H)

    ref = reference_forward(units, f0, volume, spk_vec, params)

    # 1) Default config: auto tile (full T here), bf16 writeback.
    out = unit2mel_embed(units, f0, volume, spk_vec, params)
    out = jax.block_until_ready(out)
    assert out.shape == (B, T, n_hidden)
    assert out.dtype == jnp.bfloat16
    assert jnp.allclose(out.astype(jnp.float32), ref, atol=5e-2, rtol=5e-2)

    # 2) Forced small tile: exercises the cdiv grid + padded-tail path, grid (2, 2).
    out2 = unit2mel_embed(units, f0, volume, spk_vec, params,
                          tile_t=128, out_dtype=jnp.float32)
    out2 = jax.block_until_ready(out2)
    assert out2.shape == (B, T, n_hidden)
    assert jnp.allclose(out2, ref, atol=1e-3, rtol=1e-3)

    print("KERNEL_OK")
</pallas_src>

<mosaic_0001>
module attributes {stable_mosaic.version = 11 : i64} {
  func.func @unit2mel_embed_kernel(%arg0: i32, %arg1: i32, %arg2: memref<1x200x32xbf16, #tpu.memory_space<vmem>>, %arg3: memref<1x200x2xf32, #tpu.memory_space<vmem>>, %arg4: memref<1x1x256xf32, #tpu.memory_space<vmem>>, %arg5: memref<32x256xbf16, #tpu.memory_space<vmem>>, %arg6: memref<8x256xf32, #tpu.memory_space<vmem>>, %arg7: memref<1x200x256xbf16, #tpu.memory_space<vmem>>) attributes {dimension_semantics = [#tpu.dimension_semantics<parallel>, #tpu.dimension_semantics<parallel>], iteration_bounds = array<i64: 2, 1>, scalar_prefetch = 0 : i64, scratch_operands = 0 : i64, tpu.core_type = #tpu.core_type<tc>, window_params = [{transform_indices = @transform_0, window_bounds = array<i64: 1, 200, 32>}, {transform_indices = @transform_1, window_bounds = array<i64: 1, 200, 2>}, {transform_indices = @transform_2, window_bounds = array<i64: 1, 1, 256>}, {pipeline_mode = #tpu.pipeline_mode<synchronous>, transform_indices = @transform_3, window_bounds = array<i64: 32, 256>}, {pipeline_mode = #tpu.pipeline_mode<synchronous>, transform_indices = @transform_4, window_bounds = array<i64: 8, 256>}, {transform_indices = @transform_5, window_bounds = array<i64: 1, 200, 256>}]} {
    %c0 = arith.constant 0 : index
    %c0_0 = arith.constant 0 : index
    %c0_1 = arith.constant 0 : index
    %0 = vector.load %arg2[%c0, %c0_0, %c0_1] : memref<1x200x32xbf16, #tpu.memory_space<vmem>>, vector<1x200x32xbf16>
    %1 = vector.shape_cast %0 : vector<1x200x32xbf16> to vector<200x32xbf16>
    %c0_2 = arith.constant 0 : index
    %c0_3 = arith.constant 0 : index
    %2 = vector.load %arg5[%c0_2, %c0_3] : memref<32x256xbf16, #tpu.memory_space<vmem>>, vector<32x256xbf16>
    %cst = arith.constant dense<0.000000e+00> : vector<200x256xf32>
    %3 = tpu.matmul %1, %2, %cst {dimension_numbers = #tpu.dot_dimension_numbers<[1], [0], [0], [1], [0, 0, 1, 1], [], []>} : vector<200x32xbf16>, vector<32x256xbf16>, vector<200x256xf32> -> vector<200x256xf32>
    %c0_4 = arith.constant 0 : index
    %c0_5 = arith.constant 0 : index
    %c0_6 = arith.constant 0 : index
    %4 = vector.load %arg3[%c0_4, %c0_5, %c0_6] : memref<1x200x2xf32, #tpu.memory_space<vmem>>, vector<1x200x2xf32>
    %5 = vector.shape_cast %4 : vector<1x200x2xf32> to vector<200x2xf32>
    %6 = tpu.iota {dimensions = array<i32: 1>} : vector<200x2xi32>
    %c0_i32 = arith.constant 0 : i32
    %7 = vector.broadcast %c0_i32 : i32 to vector<200x2xi32>
    %8 = arith.cmpi eq, %6, %7 : vector<200x2xi32>
    %cst_7 = arith.constant 0.00142857141 : f32
    %9 = vector.broadcast %cst_7 : f32 to vector<200x2xf32>
    %10 = arith.mulf %5, %9 : vector<200x2xf32>
    %11 = math.log1p %10 : vector<200x2xf32>
    %12 = arith.select %8, %11, %5 : vector<200x2xi1>, vector<200x2xf32>
    %c0_8 = arith.constant 0 : index
    %c0_9 = arith.constant 0 : index
    %13 = vector.load %arg6[%c0_8, %c0_9] : memref<8x256xf32, #tpu.memory_space<vmem>>, vector<2x256xf32>
    %cst_10 = arith.constant dense<0.000000e+00> : vector<200x256xf32>
    %14 = tpu.matmul %12, %13, %cst_10 {dimension_numbers = #tpu.dot_dimension_numbers<[1], [0], [0], [1], [0, 0, 1, 1], [], []>} : vector<200x2xf32>, vector<2x256xf32>, vector<200x256xf32> -> vector<200x256xf32>
    %15 = arith.addf %3, %14 : vector<200x256xf32>
    %c0_11 = arith.constant 0 : index
    %c0_12 = arith.constant 0 : index
    %c0_13 = arith.constant 0 : index
    %16 = vector.load %arg4[%c0_11, %c0_12, %c0_13] : memref<1x1x256xf32, #tpu.memory_space<vmem>>, vector<1x1x256xf32>
    %17 = vector.shape_cast %16 : vector<1x1x256xf32> to vector<1x256xf32>
    %18 = vector.broadcast %17 : vector<1x256xf32> to vector<200x256xf32>
    %19 = arith.addf %15, %18 : vector<200x256xf32>
    %20 = arith.truncf %19 : vector<200x256xf32> to vector<200x256xbf16>
    %c0_14 = arith.constant 0 : index
    %c0_15 = arith.constant 0 : index
    %c0_16 = arith.constant 0 : index
    %21 = vector.load %arg7[%c0_14, %c0_15, %c0_16] : memref<1x200x256xbf16, #tpu.memory_space<vmem>>, vector<1x200x256xbf16>
    %22 = vector.shape_cast %21 : vector<1x200x256xbf16> to vector<200x256xbf16>
    %23 = vector.shape_cast %20 : vector<200x256xbf16> to vector<1x200x256xbf16>
    tpu.vector_store %arg7[%c0_14, %c0_15, %c0_16], %23 {strides = array<i32>} : memref<1x200x256xbf16, #tpu.memory_space<vmem>>, vector<1x200x256xbf16>,
    return
  }
  func.func @transform_0(%arg0: i32, %arg1: i32) -> (i32, i32, i32) {
    %c0_i32 = arith.constant 0 : i32
    %c0_i32_0 = arith.constant 0 : i32
    return %arg0, %arg1, %c0_i32 : i32, i32, i32
  }
  func.func @transform_1(%arg0: i32, %arg1: i32) -> (i32, i32, i32) {
    %c0_i32 = arith.constant 0 : i32
    %c0_i32_0 = arith.constant 0 : i32
    return %arg0, %arg1, %c0_i32 : i32, i32, i32
  }
  func.func @transform_2(%arg0: i32, %arg1: i32) -> (i32, i32, i32) {
    %c0_i32 = arith.constant 0 : i32
    %c0_i32_0 = arith.constant 0 : i32
    %c0_i32_1 = arith.constant 0 : i32
    return %arg0, %c0_i32, %c0_i32_0 : i32, i32, i32
  }
  func.func @transform_3(%arg0: i32, %arg1: i32) -> (i32, i32) {
    %c0_i32 = arith.constant 0 : i32
    %c0_i32_0 = arith.constant 0 : i32
    %c0_i32_1 = arith.constant 0 : i32
    return %c0_i32, %c0_i32_0 : i32, i32
  }
  func.func @transform_4(%arg0: i32, %arg1: i32) -> (i32, i32) {
    %c0_i32 = arith.constant 0 : i32
    %c0_i32_0 = arith.constant 0 : i32
    %c0_i32_1 = arith.constant 0 : i32
    return %c0_i32, %c0_i32_0 : i32, i32
  }
  func.func @transform_5(%arg0: i32, %arg1: i32) -> (i32, i32, i32) {
    %c0_i32 = arith.constant 0 : i32
    %c0_i32_0 = arith.constant 0 : i32
    return %arg0, %arg1, %c0_i32 : i32, i32, i32
  }
}

</mosaic_0001>

<bundles_post_ra>
// kernel: tpu_custom_call.1
= control target key start
LH: loop header
LB: loop body
LE: loop exit
PB: predicated region body
PF: predicated region fallthrough
CT: control target
= control target key end

     0   :  { %10 = vsyncpa [#allocation3], 0  ;;  %s2313_s0 = inlined_call_operand.vmem [shape: bf16[2,200,32], index: 0, kind: input, shape index: {}]   ;;  %s2314_s1 = inlined_call_operand.vmem [shape: f32[2,200,2], index: 1, kind: input, shape index: {}]   ;;  %s2315_s2 = inlined_call_operand.vmem [shape: f32[2,1,256], index: 2, kind: input, shape index: {}]   ;;  %s2316_s3 = inlined_call_operand.vmem [shape: bf16[32,256], index: 3, kind: input, shape index: {}]   ;;  %s2317_s4 = inlined_call_operand.vmem [shape: f32[8,256], index: 4, kind: input, shape index: {}]   ;;  %s2318_s5 = inlined_call_operand.hbm [shape: bf16[2,200,256], index: 5, kind: output, shape index: {}]  }
   0x1   :  { %12 = vsyncpa [#allocation3 + $0x1], 0  ;;  %s1804_s18 = smov 0   ;;  %s1806_s19 = smov 0  }
   0x2   :  { %s1808_s20 = smov 0   ;;  %s1810_s21 = smov 0  }
   0x3   :  { %s1812_s22 = smov 0   ;;  %s1814_s23 = smov 0  }
   0x4 LB: > { %s1412_s24 = sadd.s32 4294967295, %s1770_s23   ;;  %s1413_s25 = sadd.s32 4294967294, %s1770_s23   ;;  %s1770_s23 = sphi %s1814_s23, %s18_s23   ;;  %s1766_s22 = sphi %s1812_s22, %s2343_s22   ;;  %s1762_s21 = sphi %s1810_s21, %s2342_s21   ;;  %s1758_s20 = sphi %s1808_s20, %s2341_s20   ;;  %s1754_s19 = sphi %s1806_s19, %s2340_s19   ;;  %s1750_s18 = sphi %s1804_s18, %s2339_s18  }
   0x5   : > { %s30_s26 = sadd.s32 1, %s1766_s22  ;;  %s163_s27 = sadd.s32 1, %s1758_s20 }
   0x6   : > { %p32_p0 = scmp.ge.s32.totalorder %s30_s26, 2  ;;  %p173_p1 = scmp.ne.s32.totalorder %s1758_s20, %s1754_s19 }
   0x7   : > { %p174_p2 = scmp.eq.s32.totalorder %s1412_s24, 1  ;;  %p179_p3 = scmp.ne.s32.totalorder %s1754_s19, %s1750_s18 }
   0x8   : > { %s2345_s26 = smov (%p32_p0, %s30_s26), 0  ;;  %p180_p5 = scmp.eq.s32.totalorder %s1413_s25, 1 }
   0x9   : > { %p1844_p4 = por %p174_p2, %p173_p1  ;;  %s158_s29 = ssub.s32 %s1766_s22, %s2345_s26 }
   0xa   : > { %p1416_p6 = scmp.ge.s32.totalorder %s1770_s23, 1  ;;  %p161_p7 = scmp.eq.s32.totalorder %s158_s29, 0 }
   0xb   : > { %p1851_p8 = por %p180_p5, %p179_p3  ;;  %p237_p9 = scmp.lt.s32.totalorder %s1770_s23, 3 }
   0xc   : > { %s1857_s6 = scalar_select %p161_p7, %s1758_s20, %s163_s27  }
   0xd   : > { %p238_p10 = pnand %p1416_p6, %p237_p9 }
   0xe   : > { %p283_p11 = scmp.lt.s32.totalorder (!%p238_p10), %s1762_s21, 1  ;;  %s279_s10 = sand.u32 (!%p238_p10), 1, %s1754_s19  }
   0xf   : > { %241 = sbr.rel (%p238_p10) target bundleno = 374 (0x176), region = 40  ;;  %s1285_s24 = scalar_lea.sflag (!%p238_p10), [#allocation3], %s279_s10 }
  0x10   : > { %s1581_s11 = smul.u32 (!%p238_p10), 200, %s279_s10  ;;  %s1712_s8 = scalar_lea.hbm (!%p238_p10), %s2318_s5, 400 }
  0x14   : > { %v1530_v0 = vld [vmem:[%s2316_s3 + $0x10] sm:$0xf]  ;;  %v1580_v1 = vld [vmem:[%s2316_s3 + $0x14] sm:$0xf0]  ;;  %v1579_v2 = vld [vmem:[%s2316_s3 + $0x14] sm:$0xf]  ;;  %v362_v23 = vlaneseq }
  0x15   : > { %v1531_v3 = vor.u32 %v1580_v1, %v1530_v0  ;;  %v1532_v4 = vld [vmem:[%s2316_s3 + $0x18] sm:$0xf0]  ;;  %v1522_v5 = vld [vmem:[%s2316_s3] sm:$0xf]  ;;  %v1578_v6 = vld [vmem:[%s2316_s3 + $0x4] sm:$0xf0] }
  0x16   : > { %v1535_v7 = vor.u32 %v1579_v2, %v1532_v4  ;;  %v1577_v8 = vld [vmem:[%s2316_s3 + $0x4] sm:$0xf]  ;;  %v1524_v9 = vld [vmem:[%s2316_s3 + $0x8] sm:$0xf0]  ;;  %v1523_v10 = vor.u32 %v1578_v6, %v1522_v5  ;;  %v640_v11 = vld [vmem:[%s2317_s4] sm:$0x3] }
  0x17   : > { %1038 = vmatpush.bf16.msra.mxu2 %v1531_v3  ;;  %vm718_vm0 = vcmask 1041408   ;;  %v641_v12 = vld [vmem:[%s2317_s4 + $0x8] sm:$0x3]  ;;  %v1527_v13 = vor.u32 %v1577_v8, %v1524_v9  ;;  %s1891_s12 = scalar_select %p283_p11, %s1762_s21, 1  ;;  %vm992_vm1 = vcmask 261120   ;;  %v1911_v28 = vand.u32 127, %v362_v23 }
  0x18   : > { %1111 = vmatpush.bf16.msra.mxu3 %v1535_v7  ;;  %1420 = vmatpush.msk.msra.mxu0 %vm718_vm0, %v640_v11  ;;  %vm642_vm4 = vcmask 15360  }
  0x19   : > { %1446 = vmatpush.msk.msra.mxu1 %vm718_vm0, %v641_v12  ;;  %s1582_s13 = smul.u32 100, %s1891_s12  ;;  %vm364_vm3 = vcmp.eq.s32.totalorder %v1911_v28, 0  ;;  %s1419_s29 = sshll.u32 %s1891_s12, 1 }
  0x1a   : > { %s1583_s14 = smul.u32 200, %s1891_s12  ;;  %s305_s9 = scalar_lea.vmem %s2315_s2, %s1419_s29 }
  0x1b   : > { %1039 = vmatpush.bf16.msra.mxu2 %v1523_v10  ;;  %s1898_s17 = scalar_lea.vmem %s2313_s0, %s1582_s13  ;;  %s2076_s12 = scalar_lea.vmem [#allocation2], %s1581_s11 }
  0x1c   : > { %1112 = vmatpush.bf16.msra.mxu3 %v1527_v13  ;;  %v1565_v14 = vld [vmem:[%s1898_s17] sm:$0xff]  ;;  %s1904_s27 = scalar_lea.vmem %s2314_s1, %s1583_s14  ;;  %v1566_v37 = vld [vmem:[%s1898_s17 + $0x8] sm:$0xff]  ;;  %v1567_v62 = vld [vmem:[%s1898_s17 + $0x10] sm:$0xff]  ;;  %s1584_s13 = smul.u32 200, %s1762_s21 }
  0x1d   : > { %v337_v15 = vld [vmem:[%s1904_s27] sm:$0xff]  ;;  %v338_v16 = vld [vmem:[%s1904_s27 + $0x8] sm:$0xff]  ;;  %v339_v19 = vld [vmem:[%s1904_s27 + $0x10] sm:$0xff]  ;;  %s1300_s21 = sshll.u32 %s2076_s12, 4  ;;  %s1301_s21 = int_to_ptr.vmem [resolvable:$true] %s1300_s21 }
  0x1e   : > { %1536 = vmatmul.msk.bf16.vlgmr.msra.gmra.mxu2 %vm992_vm1, %v1565_v14  ;;  %v365_v17 = vmul.f32 0.0014285714, %v337_v15  ;;  %v366_v18 = vmul.f32 0.0014285714, %v338_v16  ;;  %v367_v24 = vmul.f32 0.0014285714, %v339_v19  ;;  %s1299_s16 = scalar_lea.hbm %s2318_s5, %s1584_s13 }
  0x1f   : > { %1549 = vmatmul.msk.bf16.vlgmr.msra.gmra.mxu3 %vm992_vm1, %v1565_v14  ;;  %v340_v32 = vld [vmem:[%s1904_s27 + $0x18] sm:$0xff]  ;;  %v341_v47 = vld [vmem:[%s1904_s27 + $0x20] sm:$0xff]  ;;  %v342_v58 = vld [vmem:[%s1904_s27 + $0x28] sm:$0xff] }
  0x20   : > { %v390_v20 = vadd.f32 1.0, %v365_v17  ;;  %v393_v21 = vmul.f32 -0.5, %v365_v17  ;;  %v399_v22 = vadd.f32 1.0, %v366_v18  ;;  %v402_v26 = vmul.f32 -0.5, %v366_v18  ;;  %v343_v6 = vld [vmem:[%s1904_s27 + $0x30] sm:$0xff] }
  0x21   : > { %v396_v27 = vand.u32 2147483647, %v365_v17  ;;  %v408_v29 = vadd.f32 1.0, %v367_v24  ;;  %v405_v34 = vand.u32 2147483647, %v366_v18  ;;  %v411_v42 = vmul.f32 -0.5, %v367_v24 }
  0x22   : > { %1642 = vlog2.f32 %v390_v20  ;;  %v394_v25 = vadd.f32 1.0, %v393_v21  ;;  %v403_v31 = vadd.f32 1.0, %v402_v26  ;;  %v368_v38 = vmul.f32 0.0014285714, %v340_v32  ;;  %v1568_v21 = vld [vmem:[%s1898_s17 + $0x18] sm:$0xff] }
  0x23   : > { %1644 = vlog2.f32 %v399_v22  ;;  %vm397_vm2 = vcmp.lt.f32.partialorder %v396_v27, 0.0004427343  ;;  %vm406_vm5 = vcmp.lt.f32.partialorder %v405_v34, 0.0004427343  ;;  %v412_v46 = vadd.f32 1.0, %v411_v42 }
  0x24   : > { %v395_v30 = vmul.f32 %v394_v25, %v365_v17  ;;  %1646 = vlog2.f32 %v408_v29  ;;  %v404_v41 = vmul.f32 %v403_v31, %v366_v18  ;;  %v417_v44 = vadd.f32 1.0, %v368_v38  ;;  %v344_v17 = vld [vmem:[%s1904_s27 + $0x38] sm:$0xff] }
  0x25   : > { %v414_v49 = vand.u32 2147483647, %v367_v24  ;;  %v369_v51 = vmul.f32 0.0014285714, %v341_v47  ;;  %v413_v53 = vmul.f32 %v412_v46, %v367_v24  ;;  %v420_v54 = vmul.f32 -0.5, %v368_v38 }
  0x26   : > { %1648 = vlog2.f32 %v417_v44  ;;  %v423_v60 = vand.u32 2147483647, %v368_v38  ;;  %v370_v63 = vmul.f32 0.0014285714, %v342_v58  ;;  %v371_v10 = vmul.f32 0.0014285714, %v343_v6 }
  0x27   : > { %vm415_vm6 = vcmp.lt.f32.partialorder %v414_v49, 0.0004427343  ;;  %v426_v55 = vadd.f32 1.0, %v369_v51  ;;  %v421_v57 = vadd.f32 1.0, %v420_v54  ;;  %v429_v2 = vmul.f32 -0.5, %v369_v51 }
  0x28   : > { %v1643_v33 = vpop.eup %1642  ;;  %vm424_vm7 = vcmp.lt.f32.partialorder %v423_v60, 0.0004427343  ;;  %v435_v3 = vadd.f32 1.0, %v370_v63  ;;  %v432_v8 = vand.u32 2147483647, %v369_v51  ;;  %v438_v13 = vmul.f32 -0.5, %v370_v63 }
  0x29   : > { %v1645_v35 = vpop.eup %1644  ;;  %v392_v36 = vmul.f32 0.6931472, %v1643_v33  ;;  %1650 = vlog2.f32 %v426_v55  ;;  %v422_v1 = vmul.f32 %v421_v57, %v368_v38  ;;  %v430_v5 = vadd.f32 1.0, %v429_v2 }
  0x2a   : > { %v401_v40 = vmul.f32 0.6931472, %v1645_v35  ;;  %v1647_v48 = vpop.eup %1646  ;;  %1652 = vlog2.f32 %v435_v3  ;;  %vm433_vm8 = vcmp.lt.f32.partialorder %v432_v8, 0.0004427343  ;;  %v444_v14 = vadd.f32 1.0, %v371_v10 }
  0x2b   : > { %v398_v39 = vsel %vm397_vm2, %v395_v30, %v392_v36  ;;  %v410_v52 = vmul.f32 0.6931472, %v1647_v48  ;;  %v431_v12 = vmul.f32 %v430_v5, %v369_v51  ;;  %v372_v22 = vmul.f32 0.0014285714, %v344_v17  ;;  %v345_v30 = vld [vmem:[%s1904_s27 + $0x40] sm:$0xff] }
  0x2c   : > { %v615_v43 = vsel %vm364_vm3, %v398_v39, %v337_v15  ;;  %v407_v45 = vsel %vm406_vm5, %v404_v41, %v401_v40  ;;  %v1649_v59 = vpop.eup %1648  ;;  %1654 = vlog2.f32 %v444_v14  ;;  %v447_v25 = vmul.f32 -0.5, %v371_v10  ;;  %v346_v41 = vld [vmem:[%s1904_s27 + $0x48] sm:$0xff] }
  0x2d   : > { %1421 = vmatmul.msk.f32.vlgmr.msra.gmra.mxu0 %vm642_vm4, %v615_v43  ;;  %1447 = vmatmul.msk.f32.vlgmr.msra.gmra.mxu1 %vm642_vm4, %v615_v43  ;;  %v616_v50 = vsel %vm364_vm3, %v407_v45, %v338_v16  ;;  %v416_v56 = vsel %vm415_vm6, %v413_v53, %v410_v52  ;;  %v419_v0 = vmul.f32 0.6931472, %v1649_v59  ;;  %v439_v16 = vadd.f32 1.0, %v438_v13  ;;  %v1569_v45 = vld [vmem:[%s1898_s17 + $0x20] sm:$0xff]  ;;  %v347_v53 = vld [vmem:[%s1904_s27 + $0x50] sm:$0xff] }
  0x2e   : > { %1537 = vmatmul.msk.bf16.gmra.mxu2 %vm992_vm1, %v1566_v37  ;;  %v617_v61 = vsel %vm364_vm3, %v416_v56, %v339_v19  ;;  %v441_v19 = vand.u32 2147483647, %v370_v63  ;;  %v453_v26 = vadd.f32 1.0, %v372_v22  ;;  %v448_v29 = vadd.f32 1.0, %v447_v25 }
  0x2f   : > { %1550 = vmatmul.msk.bf16.gmra.mxu3 %vm992_vm1, %v1566_v37  ;;  %v425_v4 = vsel %vm424_vm7, %v422_v1, %v419_v0  ;;  %v1651_v7 = vpop.eup %1650  ;;  %v440_v24 = vmul.f32 %v439_v16, %v370_v63  ;;  %v373_v34 = vmul.f32 0.0014285714, %v345_v30  ;;  %v456_v37 = vmul.f32 -0.5, %v372_v22  ;;  %v348_v0 = vld [vmem:[%s1904_s27 + $0x58] sm:$0xff] }
  0x30   : > { %v618_v9 = vsel %vm364_vm3, %v425_v4, %v340_v32  ;;  %v428_v11 = vmul.f32 0.6931472, %v1651_v7  ;;  %v1653_v18 = vpop.eup %1652  ;;  %vm442_vm9 = vcmp.lt.f32.partialorder %v441_v19, 0.0004427343  ;;  %v450_v32 = vand.u32 2147483647, %v371_v10 }
  0x31   : > { %v437_v23 = vmul.f32 0.6931472, %v1653_v18  ;;  %1656 = vlog2.f32 %v453_v26  ;;  %v449_v36 = vmul.f32 %v448_v29, %v371_v10  ;;  %v462_v38 = vadd.f32 1.0, %v373_v34  ;;  %v1570_v4 = vld [vmem:[%s1898_s17 + $0x28] sm:$0xff] }
  0x32   : > { %v434_v15 = vsel %vm433_vm8, %v431_v12, %v428_v11  ;;  %v1655_v31 = vpop.eup %1654  ;;  %vm451_vm10 = vcmp.lt.f32.partialorder %v450_v32, 0.0004427343  ;;  %v457_v40 = vadd.f32 1.0, %v456_v37  ;;  %v459_v43 = vand.u32 2147483647, %v372_v22  ;;  %v349_v12 = vld [vmem:[%s1904_s27 + $0x60] sm:$0xff] }
  0x33   : > { %v619_v20 = vsel %vm364_vm3, %v434_v15, %v341_v47  ;;  %v443_v27 = vsel %vm442_vm9, %v440_v24, %v437_v23  ;;  %v446_v35 = vmul.f32 0.6931472, %v1655_v31  ;;  %1658 = vlog2.f32 %v462_v38  ;;  %v350_v23 = vld [vmem:[%s1904_s27 + $0x68] sm:$0xff] }
  0x34   : > { %v620_v33 = vsel %vm364_vm3, %v443_v27, %v342_v58  ;;  %v374_v46 = vmul.f32 0.0014285714, %v346_v41  ;;  %v458_v48 = vmul.f32 %v457_v40, %v372_v22  ;;  %v465_v49 = vmul.f32 -0.5, %v373_v34  ;;  %v1571_v27 = vld [vmem:[%s1898_s17 + $0x30] sm:$0xff] }
  0x35   : > { %1422 = vmatmul.msk.f32.gmra.mxu0 %vm642_vm4, %v616_v50  ;;  %1448 = vmatmul.msk.f32.gmra.mxu1 %vm642_vm4, %v616_v50  ;;  %v452_v39 = vsel %vm451_vm10, %v449_v36, %v446_v35  ;;  %vm460_vm11 = vcmp.lt.f32.partialorder %v459_v43, 0.0004427343  ;;  %v468_v55 = vand.u32 2147483647, %v373_v34  ;;  %v375_v57 = vmul.f32 0.0014285714, %v347_v53 }
  0x36   : > { %v621_v44 = vsel %vm364_vm3, %v452_v39, %v343_v6  ;;  %v471_v50 = vadd.f32 1.0, %v374_v46  ;;  %v466_v52 = vadd.f32 1.0, %v465_v49  ;;  %v474_v60 = vmul.f32 -0.5, %v374_v46  ;;  %v351_v36 = vld [vmem:[%s1904_s27 + $0x70] sm:$0xff] }
  0x37   : > { %v1657_v42 = vpop.eup %1656  ;;  %vm469_vm12 = vcmp.lt.f32.partialorder %v468_v55, 0.0004427343  ;;  %v477_v2 = vand.u32 2147483647, %v374_v46  ;;  %v376_v5 = vmul.f32 0.0014285714, %v348_v0 }
  0x38   : > { %v455_v47 = vmul.f32 0.6931472, %v1657_v42  ;;  %1660 = vlog2.f32 %v471_v50  ;;  %v467_v59 = vmul.f32 %v466_v52, %v373_v34  ;;  %v475_v63 = vadd.f32 1.0, %v474_v60 }
  0x39   : > { %v1659_v54 = vpop.eup %1658  ;;  %v483_v8 = vmul.f32 -0.5, %v375_v57  ;;  %vm478_vm13 = vcmp.lt.f32.partialorder %v477_v2, 0.0004427343  ;;  %v486_v14 = vand.u32 2147483647, %v375_v57  ;;  %v492_v19 = vmul.f32 -0.5, %v376_v5 }
  0x3a   : > { %v461_v51 = vsel %vm460_vm11, %v458_v48, %v455_v47  ;;  %v464_v58 = vmul.f32 0.6931472, %v1659_v54  ;;  %v476_v7 = vmul.f32 %v475_v63, %v374_v46  ;;  %v377_v16 = vmul.f32 0.0014285714, %v349_v12  ;;  %v352_v47 = vld [vmem:[%s1904_s27 + $0x78] sm:$0xff] }
  0x3b   : > { %v622_v56 = vsel %vm364_vm3, %v461_v51, %v344_v17  ;;  %v484_v11 = vadd.f32 1.0, %v483_v8  ;;  %vm487_vm14 = vcmp.lt.f32.partialorder %v486_v14, 0.0004427343  ;;  %v493_v22 = vadd.f32 1.0, %v492_v19  ;;  %v1572_v51 = vld [vmem:[%s1898_s17 + $0x38] sm:$0xff] }
  0x3c   : > { %v495_v25 = vand.u32 2147483647, %v376_v5  ;;  %v378_v29 = vmul.f32 0.0014285714, %v350_v23  ;;  %v501_v32 = vmul.f32 -0.5, %v377_v16 }
  0x3d   : > { %1423 = vmatmul.msk.f32.gmra.mxu0 %vm642_vm4, %v617_v61  ;;  %1449 = vmatmul.msk.f32.gmra.mxu1 %vm642_vm4, %v617_v61  ;;  %v480_v61 = vadd.f32 1.0, %v375_v57  ;;  %v485_v18 = vmul.f32 %v484_v11, %v375_v57  ;;  %v494_v31 = vmul.f32 %v493_v22, %v376_v5  ;;  %v504_v38 = vand.u32 2147483647, %v377_v16  ;;  %v1573_v11 = vld [vmem:[%s1898_s17 + $0x40] sm:$0xff] }
  0x3e   : > { %1538 = vmatmul.msk.bf16.gmra.mxu2 %vm992_vm1, %v1567_v62  ;;  %v1661_v1 = vpop.eup %1660  ;;  %vm496_vm15 = vcmp.lt.f32.partialorder %v495_v25, 0.0004427343  ;;  %v502_v35 = vadd.f32 1.0, %v501_v32  ;;  %v379_v40 = vmul.f32 0.0014285714, %v351_v36  ;;  %v510_v43 = vmul.f32 -0.5, %v378_v29 }
  0x3f   : > { %1551 = vmatmul.msk.bf16.gmra.mxu3 %vm992_vm1, %v1567_v62  ;;  %v470_v62 = vsel %vm469_vm12, %v467_v59, %v464_v58  ;;  %1662 = vlog2.f32 %v480_v61  ;;  %v473_v6 = vmul.f32 0.6931472, %v1661_v1  ;;  %vm505_vm0 = vcmp.lt.f32.partialorder %v504_v38, 0.0004427343  ;;  %v2001_v59 = vld [vmem:[%s1904_s27 + $0x80] sm:$0xff] }
  0x40   : > { %v623_v3 = vsel %vm364_vm3, %v470_v62, %v345_v30  ;;  %v503_v42 = vmul.f32 %v502_v35, %v377_v16  ;;  %v511_v46 = vadd.f32 1.0, %v510_v43  ;;  %v513_v49 = vand.u32 2147483647, %v378_v29  ;;  %v1178_v32 = vld [vmem:[%s305_s9] sm:$0x3] }
  0x41   : > { %v479_v10 = vsel %vm478_vm13, %v476_v7, %v473_v6  ;;  %v380_v52 = vmul.f32 0.0014285714, %v352_v47  ;;  %v519_v55 = vmul.f32 -0.5, %v379_v40  ;;  %v522_v61 = vand.u32 2147483647, %v379_v40 }
  0x42   : > { %v624_v15 = vsel %vm364_vm3, %v479_v10, %v346_v41  ;;  %v512_v54 = vmul.f32 %v511_v46, %v378_v29  ;;  %vm514_vm2 = vcmp.lt.f32.partialorder %v513_v49, 0.0004427343  ;;  %v381_v63 = vmul.f32 0.0014285714, %v2001_v59  ;;  %v1574_v46 = vld [vmem:[%s1898_s17 + $0x48] sm:$0xff] }
  0x43   : > { %v520_v58 = vadd.f32 1.0, %v519_v55  ;;  %v528_v2 = vmul.f32 -0.5, %v380_v52  ;;  %vm523_vm5 = vcmp.lt.f32.partialorder %v522_v61, 0.0004427343  ;;  %v531_v8 = vand.u32 2147483647, %v380_v52 }
  0x44   : > { %v537_v14 = vmul.f32 -0.5, %v381_v63  ;;  %v2047_v38 = vperm.slane %v1178_v32, 0 }
  0x45   : > { %1424 = vmatmul.msk.f32.gmra.mxu0 %vm642_vm4, %v618_v9  ;;  %1450 = vmatmul.msk.f32.gmra.mxu1 %vm642_vm4, %v618_v9  ;;  %v489_v9 = vadd.f32 1.0, %v376_v5  ;;  %v1663_v13 = vpop.eup %1662  ;;  %v521_v1 = vmul.f32 %v520_v58, %v379_v40  ;;  %v529_v6 = vadd.f32 1.0, %v528_v2  ;;  %vm2015_vm6 = vcmp.lt.f32.partialorder %v531_v8, 0.0004427343 }
  0x46   : > { %v482_v17 = vmul.f32 0.6931472, %v1663_v13  ;;  %v538_v19 = vadd.f32 1.0, %v537_v14 }
  0x47   : > { %1664 = vlog2.f32 %v489_v9  ;;  %v530_v13 = vmul.f32 %v529_v6, %v380_v52 }
  0x4d   : > { %1425 = vmatmul.msk.f32.gmra.mxu0 %vm642_vm4, %v619_v20  ;;  %1451 = vmatmul.msk.f32.gmra.mxu1 %vm642_vm4, %v619_v20  ;;  %v498_v20 = vadd.f32 1.0, %v377_v16  ;;  %v1665_v24 = vpop.eup %1664 }
  0x4e   : > { %1539 = vmatmul.msk.bf16.gmra.mxu2 %vm992_vm1, %v1568_v21  ;;  %v491_v30 = vmul.f32 0.6931472, %v1665_v24 }
  0x4f   : > { %1552 = vmatmul.msk.bf16.gmra.mxu3 %vm992_vm1, %v1568_v21  ;;  %v488_v21 = vsel %vm487_vm14, %v485_v18, %v482_v17  ;;  %1666 = vlog2.f32 %v498_v20  ;;  %v2024_v17 = vld [vmem:[%s1904_s27 + $0x90] sm:$0xff] }
  0x50   : > { %v625_v26 = vsel %vm364_vm3, %v488_v21, %v347_v53  ;;  %v497_v34 = vsel %vm496_vm15, %v494_v31, %v491_v30  ;;  %v540_v21 = vand.u32 2147483647, %v381_v63  ;;  %v383_v24 = vmul.f32 0.0014285714, %v2024_v17 }
  0x51   : > { %v626_v39 = vsel %vm364_vm3, %v497_v34, %v348_v0 }
  0x52   : > { %vm2035_vm7 = vcmp.lt.f32.partialorder %v540_v21, 0.0004427343  ;;  %v552_v31 = vadd.f32 1.0, %v383_v24  ;;  %v558_v61 = vand.u32 2147483647, %v383_v24 }
  0x54   : > { %vm2084_vm9 = vcmp.lt.f32.partialorder %v558_v61, 0.0004427343 }
  0x55   : > { %1426 = vmatmul.msk.f32.gmra.mxu0 %vm642_vm4, %v620_v33  ;;  %1452 = vmatmul.msk.f32.gmra.mxu1 %vm642_vm4, %v620_v33  ;;  %v507_v33 = vadd.f32 1.0, %v378_v29  ;;  %v1667_v37 = vpop.eup %1666 }
  0x56   : > { %v500_v41 = vmul.f32 0.6931472, %v1667_v37 }
  0x57   : > { %1668 = vlog2.f32 %v507_v33  ;;  %v2042_v33 = vld [vmem:[%s1904_s27 + $0x98] sm:$0xff] }
  0x5d   : > { %1427 = vmatmul.msk.f32.gmra.mxu0 %vm642_vm4, %v621_v44  ;;  %1453 = vmatmul.msk.f32.gmra.mxu1 %vm642_vm4, %v621_v44  ;;  %v516_v44 = vadd.f32 1.0, %v379_v40  ;;  %v1669_v48 = vpop.eup %1668 }
  0x5e   : > { %1540 = vmatmul.msk.bf16.gmra.mxu2 %vm992_vm1, %v1569_v45  ;;  %v509_v53 = vmul.f32 0.6931472, %v1669_v48 }
  0x5f   : > { %1553 = vmatmul.msk.bf16.gmra.mxu3 %vm992_vm1, %v1569_v45  ;;  %v506_v45 = vsel %vm505_vm0, %v503_v42, %v500_v41  ;;  %1670 = vlog2.f32 %v516_v44  ;;  %v2052_v42 = vmul.f32 0.0014285714, %v2042_v33 }
  0x60   : > { %v627_v50 = vsel %vm364_vm3, %v506_v45, %v349_v12  ;;  %v515_v57 = vsel %vm514_vm2, %v512_v54, %v509_v53 }
  0x61   : > { %v628_v62 = vsel %vm364_vm3, %v515_v57, %v350_v23  ;;  %v561_v55 = vadd.f32 1.0, %v2052_v42 }
  0x65   : > { %1428 = vmatmul.msk.f32.gmra.mxu0 %vm642_vm4, %v622_v56  ;;  %1454 = vmatmul.msk.f32.gmra.mxu1 %vm642_vm4, %v622_v56  ;;  %v525_v56 = vadd.f32 1.0, %v380_v52  ;;  %v1671_v60 = vpop.eup %1670 }
  0x66   : > { %v518_v0 = vmul.f32 0.6931472, %v1671_v60 }
  0x67   : > { %1672 = vlog2.f32 %v525_v56  ;;  %v2072_v56 = vld [vmem:[%s1904_s27 + $0xa0] sm:$0xff] }
  0x68   : > { %v524_v5 = vsel %vm523_vm5, %v521_v1, %v518_v0  ;;  %v385_v0 = vmul.f32 0.0014285714, %v2072_v56 }
  0x69   : > { %v629_v10 = vsel %vm364_vm3, %v524_v5, %v351_v36 }
  0x6d   : > { %1429 = vmatmul.msk.f32.gmra.mxu0 %vm642_vm4, %v623_v3  ;;  %1455 = vmatmul.msk.f32.gmra.mxu1 %vm642_vm4, %v623_v3  ;;  %v534_v3 = vadd.f32 1.0, %v381_v63  ;;  %v1673_v7 = vpop.eup %1672 }
  0x6e   : > { %1541 = vmatmul.msk.bf16.gmra.mxu2 %vm992_vm1, %v1570_v4  ;;  %v527_v12 = vmul.f32 0.6931472, %v1673_v7 }
  0x6f   : > { %1554 = vmatmul.msk.bf16.gmra.mxu3 %vm992_vm1, %v1570_v4  ;;  %v2009_v4 = vld [vmem:[%s1904_s27 + $0x88] sm:$0xff]  ;;  %1674 = vlog2.f32 %v534_v3 }
  0x70   : > { %v382_v9 = vmul.f32 0.0014285714, %v2009_v4  ;;  %v533_v18 = vsel %vm2015_vm6, %v530_v13, %v527_v12  ;;  %v2093_v13 = vld [vmem:[%s1904_s27 + $0xa8] sm:$0xff] }
  0x71   : > { %v630_v25 = vsel %vm364_vm3, %v533_v18, %v352_v47 }
  0x72   : > { %v543_v16 = vadd.f32 1.0, %v382_v9  ;;  %v546_v29 = vmul.f32 -0.5, %v382_v9  ;;  %v549_v37 = vand.u32 2147483647, %v382_v9 }
  0x74   : > { %1676 = vlog2.f32 %v543_v16  ;;  %v547_v36 = vadd.f32 1.0, %v546_v29  ;;  %vm2060_vm8 = vcmp.lt.f32.partialorder %v549_v37, 0.0004427343  ;;  %v2119_v37 = vld [vmem:[%s1904_s27 + $0xb0] sm:$0xff] }
  0x75   : > { %1430 = vmatmul.msk.f32.gmra.mxu0 %vm642_vm4, %v624_v15  ;;  %1456 = vmatmul.msk.f32.gmra.mxu1 %vm642_vm4, %v624_v15  ;;  %v1675_v20 = vpop.eup %1674  ;;  %1678 = vlog2.f32 %v552_v31 }
  0x76   : > { %1680 = vlog2.f32 %v561_v55 }
  0x7a   : > { %v1677_v34 = vpop.eup %1676 }
  0x7b   : > { %v545_v47 = vmul.f32 0.6931472, %v1677_v34  ;;  %v1679_v57 = vpop.eup %1678 }
  0x7c   : > { %v554_v5 = vmul.f32 0.6931472, %v1679_v57  ;;  %v1681_v14 = vpop.eup %1680 }
  0x7d   : > { %1431 = vmatmul.msk.f32.gmra.mxu0 %vm642_vm4, %v625_v26  ;;  %1457 = vmatmul.msk.f32.gmra.mxu1 %vm642_vm4, %v625_v26  ;;  %v536_v26 = vmul.f32 0.6931472, %v1675_v20 }
  0x7e   : > { %1542 = vmatmul.msk.bf16.gmra.mxu2 %vm992_vm1, %v1571_v27 }
  0x7f   : > { %1555 = vmatmul.msk.bf16.gmra.mxu3 %vm992_vm1, %v1571_v27  ;;  %v539_v27 = vmul.f32 %v538_v19, %v381_v63  ;;  %v567_v19 = vand.u32 2147483647, %v2052_v42 }
  0x81   : > { %v542_v35 = vsel %vm2035_vm7, %v539_v27, %v536_v26  ;;  %v1575_v26 = vld [vmem:[%s1898_s17 + $0x50] sm:$0xff]  ;;  %v563_v27 = vmul.f32 0.6931472, %v1681_v14  ;;  %vm2107_vm10 = vcmp.lt.f32.partialorder %v567_v19, 0.0004427343 }
  0x82   : > { %v631_v45 = vsel %vm364_vm3, %v542_v35, %v2001_v59 }
  0x85   : > { %1432 = vmatmul.msk.f32.gmra.mxu0 %vm642_vm4, %v626_v39  ;;  %1458 = vmatmul.msk.f32.gmra.mxu1 %vm642_vm4, %v626_v39  ;;  %v2049_v39 = vperm.slane %v1178_v32, 1  ;;  %v573_v32 = vmul.f32 -0.5, %v385_v0 }
  0x8d   : > { %1433 = vmatmul.msk.f32.gmra.mxu0 %vm642_vm4, %v627_v50  ;;  %1459 = vmatmul.msk.f32.gmra.mxu1 %vm642_vm4, %v627_v50  ;;  %v548_v50 = vmul.f32 %v547_v36, %v382_v9  ;;  %v564_v9 = vmul.f32 -0.5, %v2052_v42 }
  0x8e   : > { %1543 = vmatmul.msk.bf16.gmra.mxu2 %vm992_vm1, %v1572_v51 }
  0x8f   : > { %1556 = vmatmul.msk.bf16.gmra.mxu3 %vm992_vm1, %v1572_v51  ;;  %v555_v51 = vmul.f32 -0.5, %v383_v24  ;;  %v551_v59 = vsel %vm2060_vm8, %v548_v50, %v545_v47  ;;  %v565_v18 = vadd.f32 1.0, %v564_v9  ;;  %v2125_v47 = vmul.f32 0.0014285714, %v2119_v37  ;;  %v1576_v9 = vld [vmem:[%s1898_s17 + $0x58] sm:$0xff] }
  0x90   : > { %v632_v3 = vsel %vm364_vm3, %v551_v59, %v2009_v4  ;;  %v570_v4 = vadd.f32 1.0, %v385_v0 }
  0x91   : > { %v556_v60 = vadd.f32 1.0, %v555_v51  ;;  %v566_v31 = vmul.f32 %v565_v18, %v2052_v42  ;;  %v591_v14 = vmul.f32 -0.5, %v2125_v47 }
  0x92   : > { %1682 = vlog2.f32 %v570_v4 }
  0x93   : > { %v557_v8 = vmul.f32 %v556_v60, %v383_v24  ;;  %v569_v42 = vsel %vm2107_vm10, %v566_v31, %v563_v27  ;;  %v2141_v60 = vld [vmem:[%s1904_s27 + $0xb8] sm:$0xff] }
  0x94   : > { %v634_v50 = vsel %vm364_vm3, %v569_v42, %v2042_v33  ;;  %v588_v33 = vadd.f32 1.0, %v2125_v47 }
  0x95   : > { %1434 = vmatmul.msk.f32.gmra.mxu0 %vm642_vm4, %v628_v62  ;;  %1460 = vmatmul.msk.f32.gmra.mxu1 %vm642_vm4, %v628_v62  ;;  %v560_v16 = vsel %vm2084_vm9, %v557_v8, %v554_v5  ;;  %v2148_v5 = vmul.f32 0.0014285714, %v2141_v60 }
  0x9d   : > { %1435 = vmatmul.msk.f32.gmra.mxu0 %vm642_vm4, %v629_v10  ;;  %1461 = vmatmul.msk.f32.gmra.mxu1 %vm642_vm4, %v629_v10 }
  0x9e   : > { %1544 = vmatmul.msk.bf16.gmra.mxu2 %vm992_vm1, %v1573_v11 }
  0x9f   : > { %1557 = vmatmul.msk.bf16.gmra.mxu3 %vm992_vm1, %v1573_v11 }
  0xa1   : > { %v1041_v22 = vpop.f32.mrf.mxu2 }
  0xa2   : > { %v1114_v23 = vpop.f32.mrf.mxu3 }
  0xa5   : > { %1436 = vmatmul.msk.f32.gmra.mxu0 %vm642_vm4, %v630_v25  ;;  %1462 = vmatmul.msk.f32.gmra.mxu1 %vm642_vm4, %v630_v25  ;;  %v633_v25 = vsel %vm364_vm3, %v560_v16, %v2024_v17 }
  0xa9   : > { %v1043_v40 = vpop.f32.mrf.mxu2 }
  0xaa   : > { %v1116_v41 = vpop.f32.mrf.mxu3  ;;  %v742_v43 = vpop.f32.mrf.mxu0 }
  0xab   : > { %v834_v44 = vpop.f32.mrf.mxu1  ;;  %v1042_v48 = vadd.f32 %v1041_v22, %v742_v43  ;;  %v2100_v22 = vmul.f32 0.0014285714, %v2093_v13  ;;  %v574_v43 = vadd.f32 1.0, %v573_v32 }
  0xac   : > { %v1115_v49 = vadd.f32 %v1114_v23, %v834_v44  ;;  %v576_v44 = vand.u32 2147483647, %v385_v0 }
  0xad   : > { %v1184_v53 = vadd.f32 %v2047_v38, %v1042_v48  ;;  %1437 = vmatmul.msk.f32.gmra.mxu0 %vm642_vm4, %v631_v45  ;;  %1463 = vmatmul.msk.f32.gmra.mxu1 %vm642_vm4, %v631_v45  ;;  %v579_v17 = vadd.f32 1.0, %v2100_v22  ;;  %v582_v55 = vmul.f32 -0.5, %v2100_v22 }
  0xae   : > { %v1185_v54 = vadd.f32 %v2049_v39, %v1115_v49  ;;  %1545 = vmatmul.msk.bf16.gmra.mxu2 %vm992_vm1, %v1574_v46  ;;  %vm2131_vm11 = vcmp.lt.f32.partialorder %v576_v44, 0.0004427343 }
  0xaf   : > { %1558 = vmatmul.msk.bf16.gmra.mxu3 %vm992_vm1, %v1574_v46  ;;  %1684 = vlog2.f32 %v579_v17  ;;  %v332_v17 = vld [vmem:[%s1898_s17 + $0x60] sm:$0xf]  ;;  %s1302_s17 = sshll.u32 %s1299_s16, 4  ;;  %s1303_s17 = int_to_ptr.hbm [resolvable:$true] %s1302_s17 }
  0xb0   : > { %v1234_v58 = vpack.c.bf16 %v1185_v54, %v1184_v53  ;;  %v575_v54 = vmul.f32 %v574_v43, %v385_v0  ;;  %v583_v0 = vadd.f32 1.0, %v582_v55  ;;  %1686 = vlog2.f32 %v588_v33  ;;  %s1706_s25 = sshra.s32 %s1303_s17, 4  ;;  %s1707_s25 = int_to_ptr.hbm [resolvable:$true] %s1706_s25 }
  0xb1   : > { %v1046_v62 = vpop.f32.mrf.mxu2  ;;  %p1713_p1 = scmp.lt.s32.totalorder %s1707_s25, %s2318_s5 }
  0xb2   : > { %1259 = vst [vmem:[%s2076_s12] sm:$0xff] %v1234_v58  ;;  %v1119_v63 = vpop.f32.mrf.mxu3  ;;  %v745_v1 = vpop.f32.mrf.mxu0  ;;  %v584_v4 = vmul.f32 %v583_v0, %v2100_v22 }
  0xb3   : > { %v837_v2 = vpop.f32.mrf.mxu1  ;;  %v1044_v6 = vadd.f32 %v1043_v40, %v745_v1  ;;  %v1683_v40 = vpop.eup %1682  ;;  %v585_v1 = vand.u32 2147483647, %v2100_v22  ;;  %v592_v22 = vadd.f32 1.0, %v591_v14 }
  0xb4   : > { %v1117_v7 = vadd.f32 %v1116_v41, %v837_v2  ;;  %v572_v51 = vmul.f32 0.6931472, %v1683_v40  ;;  %v600_v40 = vmul.f32 -0.5, %v2148_v5 }
  0xb5   : > { %v1186_v11 = vadd.f32 %v2047_v38, %v1044_v6  ;;  %1438 = vmatmul.msk.f32.gmra.mxu0 %vm642_vm4, %v632_v3  ;;  %1464 = vmatmul.msk.f32.gmra.mxu1 %vm642_vm4, %v632_v3  ;;  %v1685_v61 = vpop.eup %1684  ;;  %vm2156_vm12 = vcmp.lt.f32.partialorder %v585_v1, 0.0004427343 }
  0xb6   : > { %v1187_v12 = vadd.f32 %v2049_v39, %v1117_v7  ;;  %v581_v10 = vmul.f32 0.6931472, %v1685_v61  ;;  %v1687_v19 = vpop.eup %1686 }
  0xb7   : > { %v590_v31 = vmul.f32 0.6931472, %v1687_v19 }
  0xb8   : > { %v1235_v15 = vpack.c.bf16 %v1187_v12, %v1186_v11 }
  0xb9   : > { %v1048_v20 = vpop.f32.mrf.mxu2 }
  0xba   : > { %1260 = vst [vmem:[%s2076_s12 + $0x8] sm:$0xff] %v1235_v15  ;;  %v1121_v21 = vpop.f32.mrf.mxu3  ;;  %v748_v23 = vpop.f32.mrf.mxu0 }
  0xbb   : > { %v840_v24 = vpop.f32.mrf.mxu1  ;;  %v1047_v29 = vadd.f32 %v1046_v62, %v748_v23  ;;  %v2170_v23 = vld [vmem:[%s1904_s27 + $0xc0] sm:$0xff]  ;;  %s1708_s27 = scalar_lea.hbm %s1707_s25, 200 }
  0xbc   : > { %v1120_v30 = vadd.f32 %v1119_v63, %v840_v24  ;;  %v578_v63 = vsel %vm2131_vm11, %v575_v54, %v572_v51  ;;  %v594_v24 = vand.u32 2147483647, %v2125_v47  ;;  %v389_v32 = vmul.f32 0.0014285714, %v2170_v23  ;;  %p1709_p12 = scmp.ne.s32.totalorder %s1707_s25, %s1708_s27  ;;  %p1714_p2 = scmp.lt.s32.totalorder %s1712_s8, %s1708_s27 }
  0xbd   : > { %v1188_v35 = vadd.f32 %v2047_v38, %v1047_v29  ;;  %1439 = vmatmul.msk.f32.gmra.mxu0 %vm642_vm4, %v633_v25  ;;  %1465 = vmatmul.msk.f32.gmra.mxu1 %vm642_vm4, %v633_v25  ;;  %v635_v8 = vsel %vm364_vm3, %v578_v63, %v2072_v56  ;;  %v597_v56 = vadd.f32 1.0, %v2148_v5 }
  0xbe   : > { %v1189_v36 = vadd.f32 %v2049_v39, %v1120_v30  ;;  %1546 = vmatmul.msk.bf16.gmra.mxu2 %vm992_vm1, %v1575_v26  ;;  %vm2181_vm13 = vcmp.lt.f32.partialorder %v594_v24, 0.0004427343  ;;  %v606_v44 = vadd.f32 1.0, %v389_v32  ;;  %v609_v61 = vmul.f32 -0.5, %v389_v32  ;;  %p1710_p13 = pnand %p1709_p12, %p1844_p4  ;;  %p1715_p3 = por %p1714_p2, %p1713_p1 }
  0xbf   : > { %1559 = vmatmul.msk.bf16.gmra.mxu3 %vm992_vm1, %v1575_v26  ;;  %1688 = vlog2.f32 %v597_v56 }
  0xc0   : > { %v1236_v41 = vpack.c.bf16 %v1189_v36, %v1188_v35  ;;  %v593_v36 = vmul.f32 %v592_v22, %v2125_v47  ;;  %1690 = vlog2.f32 %v606_v44  ;;  %p1711_p0 = pneg %p1710_p13 }
  0xc1   : > { %v1051_v45 = vpop.f32.mrf.mxu2 }
  0xc2   : > { %1261 = vst [vmem:[%s2076_s12 + $0x10] sm:$0xff] %v1236_v41  ;;  %v1124_v46 = vpop.f32.mrf.mxu3  ;;  %v751_v48 = vpop.f32.mrf.mxu0  ;;  %v596_v47 = vsel %vm2181_vm13, %v593_v36, %v590_v31  ;;  %p1716_p5 = pnand %p1715_p3, %p1711_p0 }
  0xc3   : > { %v843_v49 = vpop.f32.mrf.mxu1  ;;  %v1049_v52 = vadd.f32 %v1048_v20, %v751_v48  ;;  %v601_v48 = vadd.f32 1.0, %v600_v40  ;;  %v637_v54 = vsel %vm364_vm3, %v596_v47, %v2119_v37 }
  0xc4   : > { %v1122_v53 = vadd.f32 %v1121_v21, %v843_v49  ;;  %v587_v21 = vsel %vm2156_vm12, %v584_v4, %v581_v10  ;;  %v603_v49 = vand.u32 2147483647, %v2148_v5 }
  0xc5   : > { %v1190_v58 = vadd.f32 %v2047_v38, %v1049_v52  ;;  %1440 = vmatmul.msk.f32.gmra.mxu0 %vm642_vm4, %v634_v50  ;;  %1466 = vmatmul.msk.f32.gmra.mxu1 %vm642_vm4, %v634_v50  ;;  %v636_v30 = vsel %vm364_vm3, %v587_v21, %v2093_v13  ;;  %v958_v13 = vunpack.c.l.b16 %v332_v17  ;;  %v602_v33 = vmul.f32 %v601_v48, %v2148_v5 }
  0xc6   : > { %v1191_v59 = vadd.f32 %v2049_v39, %v1122_v53  ;;  %vm2197_vm14 = vcmp.lt.f32.partialorder %v603_v49, 0.0004427343  ;;  %v612_v5 = vand.u32 2147483647, %v389_v32 }
  0xc7   : > { %v971_v55 = vpack.c.b16 %v958_v13, %v958_v13 }
  0xc8   : > { %v1237_v62 = vpack.c.bf16 %v1191_v59, %v1190_v58 }
  0xc9   : > { %v1053_v2 = vpop.f32.mrf.mxu2 }
  0xca   : > { %1262 = vst [vmem:[%s2076_s12 + $0x18] sm:$0xff] %v1237_v62  ;;  %v1126_v3 = vpop.f32.mrf.mxu3  ;;  %v754_v6 = vpop.f32.mrf.mxu0 }
  0xcb   : > { %v846_v7 = vpop.f32.mrf.mxu1  ;;  %v1052_v11 = vadd.f32 %v1051_v45, %v754_v6  ;;  %v1689_v45 = vpop.eup %1688 }
  0xcc   : > { %v1125_v12 = vadd.f32 %v1124_v46, %v846_v7  ;;  %v599_v57 = vmul.f32 0.6931472, %v1689_v45 }
  0xcd   : > { %v1192_v16 = vadd.f32 %v2047_v38, %v1052_v11  ;;  %1441 = vmatmul.msk.f32.gmra.mxu0 %vm642_vm4, %v635_v8  ;;  %1467 = vmatmul.msk.f32.gmra.mxu1 %vm642_vm4, %v635_v8 }
  0xce   : > { %v1193_v18 = vadd.f32 %v2049_v39, %v1125_v12  ;;  %1547 = vmatmul.msk.bf16.gmra.mxu2 %vm992_vm1, %v1576_v9  ;;  %v605_v1 = vsel %vm2197_vm14, %v602_v33, %v599_v57 }
  0xcf   : > { %1560 = vmatmul.msk.bf16.gmra.mxu3 %vm992_vm1, %v1576_v9  ;;  %v638_v10 = vsel %vm364_vm3, %v605_v1, %v2141_v60 }
  0xd0   : > { %v1238_v20 = vpack.c.bf16 %v1193_v18, %v1192_v16 }
  0xd1   : > { %v1056_v25 = vpop.f32.mrf.mxu2 }
  0xd2   : > { %1263 = vst [vmem:[%s2076_s12 + $0x20] sm:$0xff] %v1238_v20  ;;  %v1129_v26 = vpop.f32.mrf.mxu3  ;;  %v757_v27 = vpop.f32.mrf.mxu0 }
  0xd3   : > { %v849_v29 = vpop.f32.mrf.mxu1  ;;  %v1054_v34 = vadd.f32 %v1053_v2, %v757_v27  ;;  %v610_v2 = vadd.f32 1.0, %v609_v61 }
  0xd4   : > { %v1127_v35 = vadd.f32 %v1126_v3, %v849_v29  ;;  %v1691_v3 = vpop.eup %1690 }
  0xd5   : > { %v1194_v42 = vadd.f32 %v2047_v38, %v1054_v34  ;;  %1442 = vmatmul.msk.f32.gmra.mxu0 %vm642_vm4, %v636_v30  ;;  %1468 = vmatmul.msk.f32.gmra.mxu1 %vm642_vm4, %v636_v30  ;;  %v608_v4 = vmul.f32 0.6931472, %v1691_v3  ;;  %v611_v14 = vmul.f32 %v610_v2, %v389_v32 }
  0xd6   : > { %v1195_v43 = vadd.f32 %v2049_v39, %v1127_v35 }
  0xd8   : > { %v1239_v46 = vpack.c.bf16 %v1195_v43, %v1194_v42 }
  0xd9   : > { %v1058_v50 = vpop.f32.mrf.mxu2 }
  0xda   : > { %1264 = vst [vmem:[%s2076_s12 + $0x28] sm:$0xff] %v1239_v46  ;;  %v1131_v51 = vpop.f32.mrf.mxu3  ;;  %v760_v52 = vpop.f32.mrf.mxu0 }
  0xdb   : > { %v852_v53 = vpop.f32.mrf.mxu1  ;;  %v1057_v58 = vadd.f32 %v1056_v25, %v760_v52 }
  0xdc   : > { %v1130_v59 = vadd.f32 %v1129_v26, %v852_v53 }
  0xdd   : > { %v1196_v63 = vadd.f32 %v2047_v38, %v1057_v58  ;;  %1443 = vmatmul.msk.f32.gmra.mxu0 %vm642_vm4, %v637_v54  ;;  %1469 = vmatmul.msk.f32.gmra.mxu1 %vm642_vm4, %v637_v54 }
  0xde   : > { %v1197_v0 = vadd.f32 %v2049_v39, %v1130_v59  ;;  %1548 = vmatmul.msk.bf16.gmra.mxu2 %vm992_vm1, %v971_v55 }
  0xdf   : > { %1561 = vmatmul.msk.bf16.gmra.mxu3 %vm992_vm1, %v971_v55  ;;  %vm613_vm1 = vcmp.lt.f32.partialorder %v612_v5, 0.0004427343 }
  0xe0   : > { %v1240_v37 = vpack.c.bf16 %v1197_v0, %v1196_v63  ;;  %v614_v56 = vsel %vm613_vm1, %v611_v14, %v608_v4 }
  0xe1   : > { %v1061_v6 = vpop.f32.mrf.mxu2  ;;  %v639_v22 = vsel %vm364_vm3, %v614_v56, %v2170_v23 }
  0xe2   : > { %1265 = vst [vmem:[%s2076_s12 + $0x30] sm:$0xff] %v1240_v37  ;;  %v1134_v7 = vpop.f32.mrf.mxu3  ;;  %v763_v8 = vpop.f32.mrf.mxu0 }
  0xe3   : > { %v855_v9 = vpop.f32.mrf.mxu1  ;;  %v1059_v11 = vadd.f32 %v1058_v50, %v763_v8 }
  0xe4   : > { %v1132_v12 = vadd.f32 %v1131_v51, %v855_v9 }
  0xe5   : > { %v1198_v15 = vadd.f32 %v2047_v38, %v1059_v11  ;;  %1444 = vmatmul.msk.f32.gmra.mxu0 %vm642_vm4, %v638_v10  ;;  %1470 = vmatmul.msk.f32.gmra.mxu1 %vm642_vm4, %v638_v10 }
  0xe6   : > { %v1199_v16 = vadd.f32 %v2049_v39, %v1132_v12 }
  0xe8   : > { %v1241_v18 = vpack.c.bf16 %v1199_v16, %v1198_v15 }
  0xe9   : > { %v1063_v19 = vpop.f32.mrf.mxu2 }
  0xea   : > { %1266 = vst [vmem:[%s2076_s12 + $0x38] sm:$0xff] %v1241_v18  ;;  %v1136_v20 = vpop.f32.mrf.mxu3  ;;  %v766_v60 = vpop.f32.mrf.mxu0 }
  0xeb   : > { %v858_v21 = vpop.f32.mrf.mxu1  ;;  %v1062_v24 = vadd.f32 %v1061_v6, %v766_v60 }
  0xec   : > { %v1135_v25 = vadd.f32 %v1134_v7, %v858_v21 }
  0xed   : > { %v1200_v26 = vadd.f32 %v2047_v38, %v1062_v24  ;;  %1445 = vmatmul.msk.f32.gmra.mxu0 %vm642_vm4, %v639_v22  ;;  %1471 = vmatmul.msk.f32.gmra.mxu1 %vm642_vm4, %v639_v22 }
  0xee   : > { %v1201_v27 = vadd.f32 %v2049_v39, %v1135_v25 }
  0xf0   : > { %v1242_v29 = vpack.c.bf16 %v1201_v27, %v1200_v26 }
  0xf1   : > { %v1066_v30 = vpop.f32.mrf.mxu2 }
  0xf2   : > { %1267 = vst [vmem:[%s2076_s12 + $0x40] sm:$0xff] %v1242_v29  ;;  %v1139_v31 = vpop.f32.mrf.mxu3  ;;  %v769_v32 = vpop.f32.mrf.mxu0 }
  0xf3   : > { %v861_v34 = vpop.f32.mrf.mxu1  ;;  %v1064_v28 = vadd.f32 %v1063_v19, %v769_v32 }
  0xf4   : > { %v1137_v23 = vadd.f32 %v1136_v20, %v861_v34 }
  0xf5   : > { %v1202_v35 = vadd.f32 %v2047_v38, %v1064_v28 }
  0xf6   : > { %v1203_v36 = vadd.f32 %v2049_v39, %v1137_v23 }
  0xf8   : > { %v1243_v17 = vpack.c.bf16 %v1203_v36, %v1202_v35 }
  0xf9   : > { %v1068_v40 = vpop.f32.mrf.mxu2 }
  0xfa   : > { %1268 = vst [vmem:[%s2076_s12 + $0x48] sm:$0xff] %v1243_v17  ;;  %v1141_v41 = vpop.f32.mrf.mxu3  ;;  %v772_v42 = vpop.f32.mrf.mxu0 }
  0xfb   : > { %v864_v43 = vpop.f32.mrf.mxu1  ;;  %v1067_v13 = vadd.f32 %v1066_v30, %v772_v42 }
  0xfc   : > { %v1140_v44 = vadd.f32 %v1139_v31, %v864_v43 }
  0xfd   : > { %v1204_v45 = vadd.f32 %v2047_v38, %v1067_v13 }
  0xfe   : > { %v1205_v46 = vadd.f32 %v2049_v39, %v1140_v44 }
 0x100   : > { %v1244_v47 = vpack.c.bf16 %v1205_v46, %v1204_v45 }
 0x101   : > { %v1071_v48 = vpop.f32.mrf.mxu2 }
 0x102   : > { %1269 = vst [vmem:[%s2076_s12 + $0x50] sm:$0xff] %v1244_v47  ;;  %v1144_v49 = vpop.f32.mrf.mxu3  ;;  %v775_v50 = vpop.f32.mrf.mxu0 }
 0x103   : > { %v867_v51 = vpop.f32.mrf.mxu1  ;;  %v1069_v52 = vadd.f32 %v1068_v40, %v775_v50 }
 0x104   : > { %v1142_v53 = vadd.f32 %v1141_v41, %v867_v51 }
 0x105   : > { %v1206_v54 = vadd.f32 %v2047_v38, %v1069_v52 }
 0x106   : > { %v1207_v55 = vadd.f32 %v2049_v39, %v1142_v53 }
 0x108   : > { %v1245_v57 = vpack.c.bf16 %v1207_v55, %v1206_v54 }
 0x109   : > { %v1073_v58 = vpop.f32.mrf.mxu2 }
 0x10a   : > { %1270 = vst [vmem:[%s2076_s12 + $0x58] sm:$0xff] %v1245_v57  ;;  %v1146_v59 = vpop.f32.mrf.mxu3  ;;  %v778_v33 = vpop.f32.mrf.mxu0 }
 0x10b   : > { %v870_v61 = vpop.f32.mrf.mxu1  ;;  %v1072_v62 = vadd.f32 %v1071_v48, %v778_v33 }
 0x10c   : > { %v1145_v63 = vadd.f32 %v1144_v49, %v870_v61 }
 0x10d   : > { %v1208_v0 = vadd.f32 %v2047_v38, %v1072_v62 }
 0x10e   : > { %v1209_v37 = vadd.f32 %v2049_v39, %v1145_v63 }
 0x110   : > { %v1246_v1 = vpack.c.bf16 %v1209_v37, %v1208_v0 }
 0x111   : > { %v1076_v2 = vpop.f32.mrf.mxu2 }
 0x112   : > { %1271 = vst [vmem:[%s2076_s12 + $0x60] sm:$0xff] %v1246_v1  ;;  %v1149_v3 = vpop.f32.mrf.mxu3  ;;  %v781_v5 = vpop.f32.mrf.mxu0 }
 0x113   : > { %v873_v6 = vpop.f32.mrf.mxu1  ;;  %v1074_v7 = vadd.f32 %v1073_v58, %v781_v5 }
 0x114   : > { %v1147_v8 = vadd.f32 %v1146_v59, %v873_v6 }
 0x115   : > { %v1210_v9 = vadd.f32 %v2047_v38, %v1074_v7 }
 0x116   : > { %v1211_v10 = vadd.f32 %v2049_v39, %v1147_v8 }
 0x118   : > { %v1247_v11 = vpack.c.bf16 %v1211_v10, %v1210_v9 }
 0x119   : > { %v1078_v12 = vpop.f32.mrf.mxu2 }
 0x11a   : > { %1272 = vst [vmem:[%s2076_s12 + $0x68] sm:$0xff] %v1247_v11  ;;  %v1151_v4 = vpop.f32.mrf.mxu3  ;;  %v784_v14 = vpop.f32.mrf.mxu0 }
 0x11b   : > { %v876_v15 = vpop.f32.mrf.mxu1  ;;  %v1077_v16 = vadd.f32 %v1076_v2, %v784_v14 }
 0x11c   : > { %v1150_v18 = vadd.f32 %v1149_v3, %v876_v15 }
 0x11d   : > { %v1212_v56 = vadd.f32 %v2047_v38, %v1077_v16 }
 0x11e   : > { %v1213_v19 = vadd.f32 %v2049_v39, %v1150_v18 }
 0x120   : > { %v1248_v20 = vpack.c.bf16 %v1213_v19, %v1212_v56 }
 0x121   : > { %v1081_v60 = vpop.f32.mrf.mxu2 }
 0x122   : > { %1273 = vst [vmem:[%s2076_s12 + $0x70] sm:$0xff] %v1248_v20  ;;  %v1154_v21 = vpop.f32.mrf.mxu3  ;;  %v787_v22 = vpop.f32.mrf.mxu0 }
 0x123   : > { %v879_v24 = vpop.f32.mrf.mxu1  ;;  %v1079_v25 = vadd.f32 %v1078_v12, %v787_v22 }
 0x124   : > { %v1152_v26 = vadd.f32 %v1151_v4, %v879_v24 }
 0x125   : > { %v1214_v27 = vadd.f32 %v2047_v38, %v1079_v25 }
 0x126   : > { %v1215_v29 = vadd.f32 %v2049_v39, %v1152_v26 }
 0x128   : > { %v1249_v30 = vpack.c.bf16 %v1215_v29, %v1214_v27 }
 0x129   : > { %v1083_v31 = vpop.f32.mrf.mxu2 }
 0x12a   : > { %1274 = vst [vmem:[%s2076_s12 + $0x78] sm:$0xff] %v1249_v30  ;;  %v1156_v32 = vpop.f32.mrf.mxu3  ;;  %v790_v34 = vpop.f32.mrf.mxu0 }
 0x12b   : > { %v882_v28 = vpop.f32.mrf.mxu1  ;;  %v1082_v23 = vadd.f32 %v1081_v60, %v790_v34 }
 0x12c   : > { %v1155_v35 = vadd.f32 %v1154_v21, %v882_v28 }
 0x12d   : > { %v1216_v36 = vadd.f32 %v2047_v38, %v1082_v23 }
 0x12e   : > { %v1217_v17 = vadd.f32 %v2049_v39, %v1155_v35 }
 0x130   : > { %v1250_v40 = vpack.c.bf16 %v1217_v17, %v1216_v36 }
 0x131   : > { %v1086_v41 = vpop.f32.mrf.mxu2 }
 0x132   : > { %1275 = vst [vmem:[%s2076_s12 + $0x80] sm:$0xff] %v1250_v40  ;;  %v1159_v42 = vpop.f32.mrf.mxu3  ;;  %v793_v43 = vpop.f32.mrf.mxu0 }
 0x133   : > { %v885_v13 = vpop.f32.mrf.mxu1  ;;  %v1084_v44 = vadd.f32 %v1083_v31, %v793_v43 }
 0x134   : > { %v1157_v45 = vadd.f32 %v1156_v32, %v885_v13 }
 0x135   : > { %v1218_v46 = vadd.f32 %v2047_v38, %v1084_v44 }
 0x136   : > { %v1219_v47 = vadd.f32 %v2049_v39, %v1157_v45 }
 0x138   : > { %v1251_v48 = vpack.c.bf16 %v1219_v47, %v1218_v46 }
 0x139   : > { %v1088_v49 = vpop.f32.mrf.mxu2 }
 0x13a   : > { %1276 = vst [vmem:[%s2076_s12 + $0x88] sm:$0xff] %v1251_v48  ;;  %v1161_v50 = vpop.f32.mrf.mxu3  ;;  %v796_v51 = vpop.f32.mrf.mxu0 }
 0x13b   : > { %v888_v52 = vpop.f32.mrf.mxu1  ;;  %v1087_v53 = vadd.f32 %v1086_v41, %v796_v51 }
 0x13c   : > { %v1160_v54 = vadd.f32 %v1159_v42, %v888_v52 }
 0x13d   : > { %v1220_v55 = vadd.f32 %v2047_v38, %v1087_v53 }
 0x13e   : > { %v1221_v57 = vadd.f32 %v2049_v39, %v1160_v54 }
 0x140   : > { %v1252_v58 = vpack.c.bf16 %v1221_v57, %v1220_v55 }
 0x141   : > { %v1091_v59 = vpop.f32.mrf.mxu2 }
 0x142   : > { %1277 = vst [vmem:[%s2076_s12 + $0x90] sm:$0xff] %v1252_v58  ;;  %v1164_v33 = vpop.f32.mrf.mxu3  ;;  %v799_v61 = vpop.f32.mrf.mxu0 }
 0x143   : > { %v891_v62 = vpop.f32.mrf.mxu1  ;;  %v1089_v63 = vadd.f32 %v1088_v49, %v799_v61 }
 0x144   : > { %v1162_v0 = vadd.f32 %v1161_v50, %v891_v62 }
 0x145   : > { %v1222_v37 = vadd.f32 %v2047_v38, %v1089_v63 }
 0x146   : > { %v1223_v1 = vadd.f32 %v2049_v39, %v1162_v0 }
 0x148   : > { %v1253_v2 = vpack.c.bf16 %v1223_v1, %v1222_v37 }
 0x149   : > { %v1093_v3 = vpop.f32.mrf.mxu2 }
 0x14a   : > { %1278 = vst [vmem:[%s2076_s12 + $0x98] sm:$0xff] %v1253_v2  ;;  %v1166_v5 = vpop.f32.mrf.mxu3  ;;  %v802_v6 = vpop.f32.mrf.mxu0 }
 0x14b   : > { %v894_v7 = vpop.f32.mrf.mxu1  ;;  %v1092_v8 = vadd.f32 %v1091_v59, %v802_v6 }
 0x14c   : > { %v1165_v9 = vadd.f32 %v1164_v33, %v894_v7 }
 0x14d   : > { %v1224_v10 = vadd.f32 %v2047_v38, %v1092_v8 }
 0x14e   : > { %v1225_v11 = vadd.f32 %v2049_v39, %v1165_v9 }
 0x150   : > { %v1254_v12 = vpack.c.bf16 %v1225_v11, %v1224_v10 }
 0x151   : > { %v1096_v4 = vpop.f32.mrf.mxu2 }
 0x152   : > { %1279 = vst [vmem:[%s2076_s12 + $0xa0] sm:$0xff] %v1254_v12  ;;  %v1169_v14 = vpop.f32.mrf.mxu3  ;;  %v805_v15 = vpop.f32.mrf.mxu0 }
 0x153   : > { %v897_v16 = vpop.f32.mrf.mxu1  ;;  %v1094_v18 = vadd.f32 %v1093_v3, %v805_v15 }
 0x154   : > { %v1167_v56 = vadd.f32 %v1166_v5, %v897_v16 }
 0x155   : > { %v1226_v19 = vadd.f32 %v2047_v38, %v1094_v18 }
 0x156   : > { %v1227_v20 = vadd.f32 %v2049_v39, %v1167_v56 }
 0x158   : > { %v1255_v60 = vpack.c.bf16 %v1227_v20, %v1226_v19 }
 0x159   : > { %v1098_v21 = vpop.f32.mrf.mxu2 }
 0x15a   : > { %1280 = vst [vmem:[%s2076_s12 + $0xa8] sm:$0xff] %v1255_v60  ;;  %v1171_v22 = vpop.f32.mrf.mxu3  ;;  %v808_v24 = vpop.f32.mrf.mxu0 }
 0x15b   : > { %v900_v25 = vpop.f32.mrf.mxu1  ;;  %v1097_v26 = vadd.f32 %v1096_v4, %v808_v24 }
 0x15c   : > { %v1170_v27 = vadd.f32 %v1169_v14, %v900_v25 }
 0x15d   : > { %v1228_v29 = vadd.f32 %v2047_v38, %v1097_v26 }
 0x15e   : > { %v1229_v30 = vadd.f32 %v2049_v39, %v1170_v27 }
 0x160   : > { %v1256_v31 = vpack.c.bf16 %v1229_v30, %v1228_v29 }
 0x161   : > { %v1101_v32 = vpop.f32.mrf.mxu2 }
 0x162   : > { %1281 = vst [vmem:[%s2076_s12 + $0xb0] sm:$0xff] %v1256_v31  ;;  %v1174_v34 = vpop.f32.mrf.mxu3  ;;  %v811_v28 = vpop.f32.mrf.mxu0 }
 0x163   : > { %v903_v23 = vpop.f32.mrf.mxu1  ;;  %v1099_v35 = vadd.f32 %v1098_v21, %v811_v28 }
 0x164   : > { %v1172_v36 = vadd.f32 %v1171_v22, %v903_v23 }
 0x165   : > { %v1230_v17 = vadd.f32 %v2047_v38, %v1099_v35 }
 0x166   : > { %v1231_v40 = vadd.f32 %v2049_v39, %v1172_v36 }
 0x168   : > { %v1257_v41 = vpack.c.bf16 %v1231_v40, %v1230_v17 }
 0x169   : > { %v1103_v42 = vpop.f32.mrf.mxu2 }
 0x16a   : > { %1282 = vst [vmem:[%s2076_s12 + $0xb8] sm:$0xff] %v1257_v41  ;;  %v1176_v43 = vpop.f32.mrf.mxu3  ;;  %v814_v13 = vpop.f32.mrf.mxu0 }
 0x16b   : > { %v906_v44 = vpop.f32.mrf.mxu1  ;;  %v1102_v45 = vadd.f32 %v1101_v32, %v814_v13 }
 0x16c   : > { %v1175_v46 = vadd.f32 %v1174_v34, %v906_v44 }
 0x16d   : > { %v1232_v47 = vadd.f32 %v2047_v38, %v1102_v45 }
 0x16e   : > { %v1233_v48 = vadd.f32 %v2049_v39, %v1175_v46 }
 0x170   : > { %v1258_v49 = vpack.c.bf16 %v1233_v48, %v1232_v47 }
 0x172   : > { %1283 = vst [vmem:[%s2076_s12 + $0xc0] sm:$0xff] %v1258_v49 }
 0x173   : > { %1719 = shalt.err (!%p1716_p5)
}
 0x174   : > { %s1772_s10 = smov 128   ;;  %s1773_s12 = smov 8  }
 0x175   : > { %1585 = dma.vmem_to_hbm [thread:$0]  (%p1844_p4), %s1301_s21, 3200, %s1303_s17, %s1285_s24, %s1772_s10, %s1772_s10, %s1773_s12  }
 0x176 PF: > { %p1591_p6 = scmp.ge.s32.totalorder %s1770_s23, 2  ;;  %s1317_s13 = sand.u32 1, %s1750_s18  }
 0x177   : > { %s1318_s14 = scalar_lea.sflag [#allocation3], %s1317_s13 }
 0x178   : > { %p1588_p7 = pnand %p1591_p6, %p1851_p8 }
 0x17a   : > { %p1589_p9 = pneg %p1588_p7 }
 0x17c   : > { %1745 = dma.done.wait (%p1589_p9), %s1318_s14, 3200  }
 0x17d   : > { %1747 = vsyncadd (%p1589_p9), %s1318_s14, 4294964096  ;;  %s18_s23 = sadd.s32 1, %s1770_s23   ;;  %s2339_s18 = smov %s1754_s19 }
 0x17e   : > { %p15_p10 = scmp.ge.s32.totalorder %s18_s23, 4   ;;  %s2340_s19 = smov %s1758_s20 }
 0x17f   : > { %s2341_s20 = smov %s1857_s6  ;;  %s2342_s21 = smov %s1766_s22 }
 0x180   : > { %s2343_s22 = smov %s2345_s26  ;;  %17 = sbr.rel (!%p15_p10) target bundleno = 4 (0x4), region = 81 }
 0x185   :  { %1324 = vsyncpa [#allocation3], 1 }
 0x186   :  { %1326 = vsyncpa [#allocation3 + $0x1], 1 }

</bundles_post_ra>
